<compile_context>
chip_gen: v6e
topology: v6e:2x2x1
jax: 0.10.0
libtpu: 0.0.40
codegen_flags: <defaults>
</compile_context>

<pallas_src>
import functools

import jax
import jax.numpy as jnp
from jax import lax
from jax.experimental import pallas as pl
from jax.experimental.pallas import tpu as pltpu


def _round_up(a: int, b: int) -> int:
    return (a + b - 1) // b * b


def residual_linear_kernel(x_mm_ref, w_ref, x_res_ref, b_ref, o_ref, acc_ref):
    """acc(k==0) = x + b ;  acc += x_tile @ W_tile^T ;  k==last: o = acc."""
    k = pl.program_id(2)

    @pl.when(k == 0)
    def _():
        # Seed the accumulator with residual + bias: both are applied exactly
        # once per output tile, and the finalize step is just a cast+store.
        acc_ref[...] = (x_res_ref[...].astype(jnp.float32)
                        + b_ref[...].astype(jnp.float32))   # (1, tn) broadcasts

    # Contract x's feature dim against W's LAST dim (torch Linear layout:
    # W is [D_out, D_in]) -> no in-kernel transpose of the weight tile.
    acc_ref[...] += lax.dot_general(
        x_mm_ref[...], w_ref[...],
        dimension_numbers=(((1,), (1,)), ((), ())),
        preferred_element_type=jnp.float32)

    @pl.when(k == pl.num_programs(2) - 1)
    def _():
        o_ref[...] = acc_ref[...].astype(o_ref.dtype)


@functools.partial(jax.jit, static_argnames=("tm_target", "tn_target"))
def residual_linear(x, w, b, *, tm_target: int = 512, tn_target: int = 256):
    """x: [B, N, D]; w: [D_out=D, D_in=D]; b: [D].  Returns x + Linear(x)."""
    B, N, D = x.shape
    M = B * N
    x2d = x.reshape(M, D)

    # ---- tile plan -------------------------------------------------------
    # Token tile: multiple of 8 (f32 sublane), capped at tm_target.
    tm = min(tm_target, _round_up(M, 8))
    M_pad = _round_up(M, tm)
    # Feature tiles: multiples of 128 (lane-dense output), capped at tn_target.
    tn = min(tn_target, _round_up(D, 128))
    tk = tn                                   # square weight -> shared padding
    D_pad = _round_up(D, tn)

    # ---- zero-pad to tile boundaries (padded region contributes zeros) ----
    x_p = jnp.pad(x2d, ((0, M_pad - M), (0, D_pad - D)))
    w_p = jnp.pad(w, ((0, D_pad - D), (0, D_pad - D)))
    b_p = jnp.pad(b.reshape(1, D), ((0, 0), (0, D_pad - D)))

    gm, gn, gk = M_pad // tm, D_pad // tn, D_pad // tk
    grid = (gm, gn, gk)

    itemsize = jnp.dtype(x.dtype).itemsize
    cost = pl.CostEstimate(
        flops=2 * M_pad * D_pad * D_pad,
        transcendentals=0,
        # x streamed once per n-tile for the MXU + once for the residual seed;
        # W streamed once per m-tile; bias once; output written once.
        bytes_accessed=((gn + 1) * x_p.size + gm * w_p.size + b_p.size
                        + M_pad * D_pad) * itemsize,
    )

    out2d = pl.pallas_call(
        residual_linear_kernel,
        out_shape=jax.ShapeDtypeStruct((M_pad, D_pad), x.dtype),
        grid_spec=pltpu.PrefetchScalarGridSpec(
            num_scalar_prefetch=0,
            grid=grid,
            in_specs=[
                # x view feeding the MXU: (tokens, reduction)
                pl.BlockSpec((tm, tk), lambda m, n, k: (m, k)),
                # W tile: (out-features, reduction) -- torch layout, no .T
                pl.BlockSpec((tn, tk), lambda m, n, k: (n, k)),
                # x view for the residual seed: (tokens, out-features),
                # resident across the k axis (single DMA per (m, n) tile).
                pl.BlockSpec((tm, tn), lambda m, n, k: (m, n)),
                # bias: resident across m and k.
                pl.BlockSpec((1, tn), lambda m, n, k: (0, n)),
            ],
            out_specs=pl.BlockSpec((tm, tn), lambda m, n, k: (m, n)),
            scratch_shapes=[pltpu.VMEM((tm, tn), jnp.float32)],
        ),
        compiler_params=pltpu.CompilerParams(
            dimension_semantics=("parallel", "parallel", "arbitrary")),
        cost_estimate=cost,
    )(x_p, w_p, x_p, b_p)

    return out2d[:M, :D].reshape(B, N, D)


if __name__ == "__main__":
    # Small shapes consistent with the module: batch=2, seq=8, hidden=32.
    B, N, D = 2, 8, 32
    key = jax.random.PRNGKey(0)
    kx, kw, kb = jax.random.split(key, 3)

    x = jax.random.normal(kx, (B, N, D), dtype=jnp.float32)
    # Deterministic Linear params (torch.nn.Linear-style uniform init bound).
    bound = 1.0 / (D ** 0.5)
    w = jax.random.uniform(kw, (D, D), minval=-bound, maxval=bound,
                           dtype=jnp.float32)
    b = jax.random.uniform(kb, (D,), minval=-bound, maxval=bound,
                           dtype=jnp.float32)

    out = residual_linear(x, w, b)
    jax.block_until_ready(out)

    # Reference check (plain JAX): x + x @ W^T + b
    ref = x + jnp.einsum("bnd,od->bno", x, w) + b
    assert jnp.allclose(out, ref, atol=1e-5, rtol=1e-5), "mismatch vs reference"

    print("KERNEL_OK")
</pallas_src>

<mosaic_0001>
module attributes {stable_mosaic.version = 11 : i64} {
  func.func @residual_linear_kernel(%arg0: i32, %arg1: i32, %arg2: i32, %arg3: memref<16x128xf32, #tpu.memory_space<vmem>>, %arg4: memref<128x128xf32, #tpu.memory_space<vmem>>, %arg5: memref<16x128xf32, #tpu.memory_space<vmem>>, %arg6: memref<1x128xf32, #tpu.memory_space<vmem>>, %arg7: memref<16x128xf32, #tpu.memory_space<vmem>>, %arg8: memref<16x128xf32, #tpu.memory_space<vmem>>) attributes {dimension_semantics = [#tpu.dimension_semantics<parallel>, #tpu.dimension_semantics<parallel>, #tpu.dimension_semantics<arbitrary>], iteration_bounds = array<i64: 1, 1, 1>, scalar_prefetch = 0 : i64, scratch_operands = 1 : i64, tpu.core_type = #tpu.core_type<tc>, window_params = [{transform_indices = @transform_0, window_bounds = array<i64: 16, 128>}, {transform_indices = @transform_1, window_bounds = array<i64: 128, 128>}, {transform_indices = @transform_2, window_bounds = array<i64: 16, 128>}, {transform_indices = @transform_3, window_bounds = array<i64: 1, 128>}, {transform_indices = @transform_4, window_bounds = array<i64: 16, 128>}]} {
    %c0_i32 = arith.constant 0 : i32
    %0 = arith.cmpi eq, %arg2, %c0_i32 : i32
    %1 = arith.extui %0 : i1 to i32
    %c0_i32_0 = arith.constant 0 : i32
    %2 = arith.cmpi ne, %1, %c0_i32_0 : i32
    scf.if %2 {
      %c0_10 = arith.constant 0 : index
      %c0_11 = arith.constant 0 : index
      %12 = vector.load %arg5[%c0_10, %c0_11] : memref<16x128xf32, #tpu.memory_space<vmem>>, vector<16x128xf32>
      %c0_12 = arith.constant 0 : index
      %c0_13 = arith.constant 0 : index
      %13 = vector.load %arg6[%c0_12, %c0_13] : memref<1x128xf32, #tpu.memory_space<vmem>>, vector<1x128xf32>
      %14 = vector.broadcast %13 : vector<1x128xf32> to vector<16x128xf32>
      %15 = arith.addf %12, %14 : vector<16x128xf32>
      %c0_14 = arith.constant 0 : index
      %c0_15 = arith.constant 0 : index
      %16 = vector.load %arg8[%c0_14, %c0_15] : memref<16x128xf32, #tpu.memory_space<vmem>>, vector<16x128xf32>
      tpu.vector_store %arg8[%c0_14, %c0_15], %15 {strides = array<i32>} : memref<16x128xf32, #tpu.memory_space<vmem>>, vector<16x128xf32>,
    } else {
    }
    %c0 = arith.constant 0 : index
    %c0_1 = arith.constant 0 : index
    %3 = vector.load %arg8[%c0, %c0_1] : memref<16x128xf32, #tpu.memory_space<vmem>>, vector<16x128xf32>
    %c0_2 = arith.constant 0 : index
    %c0_3 = arith.constant 0 : index
    %4 = vector.load %arg3[%c0_2, %c0_3] : memref<16x128xf32, #tpu.memory_space<vmem>>, vector<16x128xf32>
    %c0_4 = arith.constant 0 : index
    %c0_5 = arith.constant 0 : index
    %5 = vector.load %arg4[%c0_4, %c0_5] : memref<128x128xf32, #tpu.memory_space<vmem>>, vector<128x128xf32>
    %cst = arith.constant dense<0.000000e+00> : vector<16x128xf32>
    %6 = tpu.matmul %4, %5, %cst {dimension_numbers = #tpu.dot_dimension_numbers<[1], [1], [0], [0], [0, 0, 1, 0], [], []>} : vector<16x128xf32>, vector<128x128xf32>, vector<16x128xf32> -> vector<16x128xf32>
    %7 = arith.addf %3, %6 : vector<16x128xf32>
    %c0_6 = arith.constant 0 : index
    %c0_7 = arith.constant 0 : index
    %8 = vector.load %arg8[%c0_6, %c0_7] : memref<16x128xf32, #tpu.memory_space<vmem>>, vector<16x128xf32>
    tpu.vector_store %arg8[%c0_6, %c0_7], %7 {strides = array<i32>} : memref<16x128xf32, #tpu.memory_space<vmem>>, vector<16x128xf32>,
    %c0_i32_8 = arith.constant 0 : i32
    %9 = arith.cmpi eq, %arg2, %c0_i32_8 : i32
    %10 = arith.extui %9 : i1 to i32
    %c0_i32_9 = arith.constant 0 : i32
    %11 = arith.cmpi ne, %10, %c0_i32_9 : i32
    scf.if %11 {
      %c0_10 = arith.constant 0 : index
      %c0_11 = arith.constant 0 : index
      %12 = vector.load %arg8[%c0_10, %c0_11] : memref<16x128xf32, #tpu.memory_space<vmem>>, vector<16x128xf32>
      %c0_12 = arith.constant 0 : index
      %c0_13 = arith.constant 0 : index
      %13 = vector.load %arg7[%c0_12, %c0_13] : memref<16x128xf32, #tpu.memory_space<vmem>>, vector<16x128xf32>
      tpu.vector_store %arg7[%c0_12, %c0_13], %12 {strides = array<i32>} : memref<16x128xf32, #tpu.memory_space<vmem>>, vector<16x128xf32>,
    } else {
    }
    return
  }
  func.func @transform_0(%arg0: i32, %arg1: i32, %arg2: i32) -> (i32, i32) {
    %c0_i32 = arith.constant 0 : i32
    return %arg0, %arg2 : i32, i32
  }
  func.func @transform_1(%arg0: i32, %arg1: i32, %arg2: i32) -> (i32, i32) {
    %c0_i32 = arith.constant 0 : i32
    return %arg1, %arg2 : i32, i32
  }
  func.func @transform_2(%arg0: i32, %arg1: i32, %arg2: i32) -> (i32, i32) {
    %c0_i32 = arith.constant 0 : i32
    return %arg0, %arg1 : i32, i32
  }
  func.func @transform_3(%arg0: i32, %arg1: i32, %arg2: i32) -> (i32, i32) {
    %c0_i32 = arith.constant 0 : i32
    %c0_i32_0 = arith.constant 0 : i32
    return %c0_i32, %arg1 : i32, i32
  }
  func.func @transform_4(%arg0: i32, %arg1: i32, %arg2: i32) -> (i32, i32) {
    %c0_i32 = arith.constant 0 : i32
    return %arg0, %arg1 : i32, i32
  }
}

</mosaic_0001>

<bundles_post_ra>
// kernel: residual_linear.1
= control target key start
LH: loop header
LB: loop body
LE: loop exit
PB: predicated region body
PF: predicated region fallthrough
CT: control target
= control target key end

     0   :  { %s292_s1 = inlined_call_operand.vmem [shape: f32[128,128], index: 1, kind: input, shape index: {}]   ;;  %s293_s0 = inlined_call_operand.vmem [shape: f32[16,128], index: 0, kind: input, shape index: {}, may-alias: {0,2}]   ;;  %s294_s2 = inlined_call_operand.vmem [shape: f32[16,128], index: 2, kind: input, shape index: {}, may-alias: {0,2}]   ;;  %s295_s3 = inlined_call_operand.vmem [shape: f32[1,128], index: 3, kind: input, shape index: {}]   ;;  %s296_s4 = inlined_call_operand.vmem [shape: f32[16,128], index: 4, kind: output, shape index: {}]  }
   0x1   :  { %v53_v0 = vld [vmem:[%s292_s1 + $0x78] sm:$0xff]  ;;  %v52_v1 = vld [vmem:[%s292_s1 + $0x70] sm:$0xff]  ;;  %v51_v2 = vld [vmem:[%s292_s1 + $0x68] sm:$0xff] }
   0x2   :  { %163 = vmatprep.subr.mxu0 %v53_v0  ;;  %v36_v3 = vld [vmem:[%s293_s0] sm:$0xff]  ;;  %v49_v5 = vld [vmem:[%s292_s1 + $0x58] sm:$0xff]  ;;  %v48_v6 = vld [vmem:[%s292_s1 + $0x50] sm:$0xff] }
   0x3   :  { %164 = vmatpush3.xpose.msra.mxu0 %v53_v0  ;;  %195 = vmatprep.mubr.f32.mxu0 %v36_v3  ;;  %v50_v4 = vld [vmem:[%s292_s1 + $0x60] sm:$0xff]  ;;  %v47_v7 = vld [vmem:[%s292_s1 + $0x48] sm:$0xff]  ;;  %v45_v9 = vld [vmem:[%s292_s1 + $0x38] sm:$0xff] }
   0x4   :  { %165 = vmatprep.subr.mxu0 %v52_v1  ;;  %v46_v8 = vld [vmem:[%s292_s1 + $0x40] sm:$0xff]  ;;  %v44_v10 = vld [vmem:[%s292_s1 + $0x30] sm:$0xff]  ;;  %v43_v11 = vld [vmem:[%s292_s1 + $0x28] sm:$0xff] }
   0x5   :  { %v42_v12 = vld [vmem:[%s292_s1 + $0x20] sm:$0xff]  ;;  %v41_v13 = vld [vmem:[%s292_s1 + $0x18] sm:$0xff]  ;;  %v40_v14 = vld [vmem:[%s292_s1 + $0x10] sm:$0xff] }
   0x6   :  { %v39_v15 = vld [vmem:[%s292_s1 + $0x8] sm:$0xff]  ;;  %v38_v16 = vld [vmem:[%s292_s1] sm:$0xff] }
   0x7   :  { %166 = vmatpush3.xpose.msra.mxu0 %v52_v1  ;;  %v37_v17 = vld [vmem:[%s293_s0 + $0x8] sm:$0xff]  ;;  %v144_v19 = vld [vmem:[%s295_s3] ss:$0 sm:$0xff] }
   0x8   :  { %167 = vmatprep.subr.mxu0 %v51_v2  ;;  %v22_v18 = vld [vmem:[%s294_s2 + $0x8] sm:$0xff]  ;;  %v21_v20 = vld [vmem:[%s294_s2] sm:$0xff] }
   0x9   :  { %v31_v21 = vadd.f32 %v144_v19, %v22_v18  ;;  %v30_v22 = vadd.f32 %v144_v19, %v21_v20 }
   0xb   :  { %168 = vmatpush3.xpose.msra.mxu0 %v51_v2 }
   0xc   :  { %169 = vmatprep.subr.mxu0 %v50_v4 }
   0xf   :  { %170 = vmatpush3.xpose.msra.mxu0 %v50_v4 }
  0x10   :  { %171 = vmatprep.subr.mxu0 %v49_v5 }
  0x13   :  { %172 = vmatpush3.xpose.msra.mxu0 %v49_v5 }
  0x14   :  { %173 = vmatprep.subr.mxu0 %v48_v6 }
  0x17   :  { %174 = vmatpush3.xpose.msra.mxu0 %v48_v6 }
  0x18   :  { %175 = vmatprep.subr.mxu0 %v47_v7 }
  0x1b   :  { %176 = vmatpush3.xpose.msra.mxu0 %v47_v7 }
  0x1c   :  { %177 = vmatprep.subr.mxu0 %v46_v8 }
  0x1f   :  { %178 = vmatpush3.xpose.msra.mxu0 %v46_v8 }
  0x20   :  { %179 = vmatprep.subr.mxu0 %v45_v9 }
  0x23   :  { %180 = vmatpush3.xpose.msra.mxu0 %v45_v9 }
  0x24   :  { %181 = vmatprep.subr.mxu0 %v44_v10 }
  0x27   :  { %182 = vmatpush3.xpose.msra.mxu0 %v44_v10 }
  0x28   :  { %183 = vmatprep.subr.mxu0 %v43_v11 }
  0x2b   :  { %184 = vmatpush3.xpose.msra.mxu0 %v43_v11 }
  0x2c   :  { %185 = vmatprep.subr.mxu0 %v42_v12 }
  0x2f   :  { %186 = vmatpush3.xpose.msra.mxu0 %v42_v12 }
  0x30   :  { %187 = vmatprep.subr.mxu0 %v41_v13 }
  0x33   :  { %188 = vmatpush3.xpose.msra.mxu0 %v41_v13 }
  0x34   :  { %189 = vmatprep.subr.mxu0 %v40_v14 }
  0x37   :  { %190 = vmatpush3.xpose.msra.mxu0 %v40_v14 }
  0x38   :  { %191 = vmatprep.subr.mxu0 %v39_v15 }
  0x3b   :  { %192 = vmatpush3.xpose.msra.mxu0 %v39_v15 }
  0x3c   :  { %193 = vmatprep.subr.mxu0 %v38_v16 }
  0x3f   :  { %194 = vmatpush3.xpose.msra.mxu0 %v38_v16 }
  0x42   :  { %196 = vmatmul.mubr.f32.vlgmr.msra.gmra.mxu0 %v37_v17 }
 0x102   :  { %v197_v23 = vpop.f32.mrf.mxu0 }
 0x103   :  { %v130_v24 = vadd.f32 %v197_v23, %v31_v21 }
 0x104   :  { %v120_v25 = vpop.f32.mrf.mxu0 }
 0x105   :  { %139 = vst [vmem:[%s296_s4 + $0x8] sm:$0xff] %v130_v24  ;;  %v129_v26 = vadd.f32 %v120_v25, %v30_v22 }
 0x107   :  { %138 = vst [vmem:[%s296_s4] sm:$0xff] %v129_v26 }

</bundles_post_ra>
